<compile_context>
chip_gen: v6e
topology: v6e:2x2x1
jax: 0.10.0
libtpu: 0.0.40
codegen_flags: <defaults>
</compile_context>

<pallas_src>
import functools

import jax
import jax.numpy as jnp
from jax.experimental import pallas as pl
from jax.experimental.pallas import tpu as pltpu

EPS = 1e-5  # PyTorch BatchNorm2d default


def _upblock_kernel(x_ref, r_ref, u_ref, pool_ref, gamma_ref, beta_ref, o_ref,
                    *, inv_count):
    """Fused upsample+pad+conv -> BN(training) -> ReLU for the whole batch.

    x_ref:     (N*W, Cin*H)        bf16, rows (b, w), lanes (c, h)
    r_ref:     (3, Cin*H, Cout*H2) bf16, conv weights folded with H selectors
    u_ref:     (N*W2, 3*N*W)       f32, W upsample/pad/kx selector, block-diag per image
    pool_ref:  (Cout*H2, Cout*H2)  f32, block-ones: sum y within channel, broadcast back
    gamma_ref: (1, Cout*H2)        f32, gamma replicated over y lanes
    beta_ref:  (1, Cout*H2)        f32, beta replicated over y lanes
    o_ref:     (N*W2, Cout*H2)     rows (b, w2), lanes (co, y)
    """
    x2d = x_ref[...]                                              # (NW, CinH)

    # Z_j = X @ R[j], sublane-stacked -> (3*NW, CoutH2), f32 accumulation.
    zcat = jnp.concatenate(
        [jnp.dot(x2d, r_ref[j], preferred_element_type=jnp.float32)
         for j in range(3)],
        axis=0)

    # One selector matmul applies W-upsample, zero-pad, kx taps and the
    # per-image block structure.  Pre-BN conv slab, rows (b, w2).
    acc = jnp.dot(u_ref[...], zcat, preferred_element_type=jnp.float32)

    # Training-mode batch stats: reduce rows (b, w2), then pool y lanes within
    # each channel (and broadcast back) via the block-ones matmul.
    s1 = jnp.sum(acc, axis=0, keepdims=True)                      # (1, CoutH2)
    s2 = jnp.sum(acc * acc, axis=0, keepdims=True)                # (1, CoutH2)
    pooled = jnp.dot(jnp.concatenate([s1, s2], axis=0), pool_ref[...],
                     preferred_element_type=jnp.float32)          # (2, CoutH2)

    mean = pooled[0:1] * inv_count
    # One-pass variance (E[x^2]-E[x]^2) in f32; clamped >= 0.  Fine for
    # activation-scale data; switch to a shifted formulation if |mean| >> std.
    var = jnp.maximum(pooled[1:2] * inv_count - mean * mean, 0.0)
    scale = gamma_ref[...] * jax.lax.rsqrt(var + EPS)
    shift = beta_ref[...] - mean * scale

    o_ref[...] = jnp.maximum(acc * scale + shift, 0.0).astype(o_ref.dtype)


def _selectors(size_in, size_out):
    """0/1 matrices S[k, out, in]: nearest-2x upsample + zero-pad-1 + shift k."""
    out_idx = jnp.arange(size_out)[:, None]
    in_idx = jnp.arange(size_in)[None, :]
    mats = []
    for k in range(3):
        src = out_idx + k - 1                   # position in upsampled axis
        valid = (src >= 0) & (src < size_out)   # zero padding outside
        mats.append(jnp.where(valid & ((src // 2) == in_idx), 1.0, 0.0))
    return jnp.stack(mats).astype(jnp.float32)  # (3, size_out, size_in)


def upblock_forward(x_nchw, w_oihw, bias, gamma, beta):
    """UpBlock forward: (N, Cin, H, W) -> (N, Cout, 2H, 2W).

    `bias` is accepted for API parity but unused: with training-mode BatchNorm
    right after the conv, the bias is exactly cancelled by mean subtraction.
    """
    del bias
    n, cin, h, w = x_nchw.shape
    cout = w_oihw.shape[0]
    h2, w2 = 2 * h, 2 * w
    f32 = jnp.float32
    bf16 = jnp.bfloat16
    cinh, couth2 = cin * h, cout * h2
    nw, nw2 = n * w, n * w2

    # ---- static selection / folded-weight matrices (tiny, wrapper-side) -----
    u3 = _selectors(w, w2)                                        # (3, W2, W)
    g3 = _selectors(h, h2)                                        # (3, H2, H)
    # R[j, c*H + h, co*H2 + y] = sum_i w[co, c, i, j] * G[i, y, h]
    r_mat = jnp.einsum('ocij,iyh->jchoy', w_oihw.astype(f32), g3)
    r_mat = r_mat.reshape(3, cinh, couth2).astype(bf16)           # MXU operand

    # Block-structured width selector for the whole batch:
    # Ubig[b*W2+w2, j*N*W + b'*W + w] = u3[j, w2, w] * (b == b')
    ubig = jnp.einsum('jyw,bc->byjcw', u3, jnp.eye(n, dtype=f32))
    ubig = ubig.reshape(nw2, 3 * nw)

    # Block-ones pooling matrix: sum over y within each channel, broadcast back.
    pool = jnp.repeat(jnp.repeat(jnp.eye(cout, dtype=f32), h2, axis=0),
                      h2, axis=1)                                 # (CoutH2, CoutH2)

    gamma_lane = jnp.repeat(gamma.astype(f32), h2).reshape(1, couth2)
    beta_lane = jnp.repeat(beta.astype(f32), h2).reshape(1, couth2)

    # Input as (N*W, Cin*H): rows (b, w), lanes (c, h).  bf16 MXU operand.
    xt = jnp.transpose(x_nchw, (0, 3, 1, 2)).reshape(nw, cinh).astype(bf16)

    flops = 2 * (3 * nw * cinh * couth2 + nw2 * 3 * nw * couth2
                 + 2 * couth2 * couth2)
    bytes_accessed = (2 * (xt.size + r_mat.size)
                      + 4 * (ubig.size + pool.size + 2 * couth2 + nw2 * couth2))
    cost = pl.CostEstimate(flops=int(flops), transcendentals=int(couth2),
                           bytes_accessed=int(bytes_accessed))

    kernel = functools.partial(_upblock_kernel,
                               inv_count=float(1.0 / (n * h2 * w2)))

    out_t = pl.pallas_call(
        kernel,
        out_shape=jax.ShapeDtypeStruct((nw2, couth2), x_nchw.dtype),
        grid=(1,),
        in_specs=[
            pl.BlockSpec((nw, cinh), lambda i: (0, 0)),
            pl.BlockSpec((3, cinh, couth2), lambda i: (0, 0, 0)),
            pl.BlockSpec((nw2, 3 * nw), lambda i: (0, 0)),
            pl.BlockSpec((couth2, couth2), lambda i: (0, 0)),
            pl.BlockSpec((1, couth2), lambda i: (0, 0)),
            pl.BlockSpec((1, couth2), lambda i: (0, 0)),
        ],
        out_specs=pl.BlockSpec((nw2, couth2), lambda i: (0, 0)),
        compiler_params=pltpu.CompilerParams(
            dimension_semantics=("arbitrary",),
            vmem_limit_bytes=32 * 1024 * 1024),
        cost_estimate=cost,
    )(xt, r_mat, ubig, pool, gamma_lane, beta_lane)

    # (N*W2, Cout*H2) -> (N, Cout, H2, W2): cheap wrapper glue.
    return out_t.reshape(n, w2, cout, h2).transpose(0, 2, 3, 1)


def upblock_reference(x, w, b, gamma, beta):
    """Pure-JAX reference mirroring the PyTorch module (NCHW, f32)."""
    xu = jnp.repeat(jnp.repeat(x, 2, axis=2), 2, axis=3)
    y = jax.lax.conv_general_dilated(
        xu, w, window_strides=(1, 1), padding=((1, 1), (1, 1)),
        dimension_numbers=('NCHW', 'OIHW', 'NCHW'))
    y = y + b[None, :, None, None]
    mean = y.mean(axis=(0, 2, 3), keepdims=True)
    var = ((y - mean) ** 2).mean(axis=(0, 2, 3), keepdims=True)
    y = (y - mean) * jax.lax.rsqrt(var + EPS)
    y = y * gamma[None, :, None, None] + beta[None, :, None, None]
    return jnp.maximum(y, 0.0)


if __name__ == "__main__":
    # Shapes consistent with UpBlock(in_ch=4, out_ch=8) on a (2, 4, 16, 16) input.
    N, IN_CH, OUT_CH, H, W = 2, 4, 8, 16, 16

    key = jax.random.PRNGKey(0)
    kx, kw, kb, kg, kbeta = jax.random.split(key, 5)

    x = jax.random.normal(kx, (N, IN_CH, H, W), dtype=jnp.float32)
    w = jax.random.normal(kw, (OUT_CH, IN_CH, 3, 3), dtype=jnp.float32) * 0.2
    b = jax.random.normal(kb, (OUT_CH,), dtype=jnp.float32) * 0.1
    gamma = 1.0 + 0.1 * jax.random.normal(kg, (OUT_CH,), dtype=jnp.float32)
    beta = 0.1 * jax.random.normal(kbeta, (OUT_CH,), dtype=jnp.float32)

    out = jax.jit(upblock_forward)(x, w, b, gamma, beta)
    out = jax.block_until_ready(out)

    ref = upblock_reference(x, w, b, gamma, beta)
    assert out.shape == (N, OUT_CH, 2 * H, 2 * W), out.shape
    # bf16 MXU operands (f32 accumulation) widen the tolerance vs. the f32 ref.
    err = float(jnp.max(jnp.abs(out - ref)))
    assert err < 2e-2, err

    print("KERNEL_OK")
</pallas_src>

<mosaic_0001>
module attributes {stable_mosaic.version = 11 : i64} {
  func.func @_upblock_kernel(%arg0: i32, %arg1: memref<32x64xbf16, #tpu.memory_space<vmem>>, %arg2: memref<3x64x256xbf16, #tpu.memory_space<vmem>>, %arg3: memref<64x96xf32, #tpu.memory_space<vmem>>, %arg4: memref<256x256xf32, #tpu.memory_space<vmem>>, %arg5: memref<1x256xf32, #tpu.memory_space<vmem>>, %arg6: memref<1x256xf32, #tpu.memory_space<vmem>>, %arg7: memref<64x256xf32, #tpu.memory_space<vmem>>) attributes {dimension_semantics = [#tpu.dimension_semantics<arbitrary>], iteration_bounds = array<i64: 1>, scalar_prefetch = 0 : i64, scratch_operands = 0 : i64, tpu.core_type = #tpu.core_type<tc>, window_params = [{pipeline_mode = #tpu.pipeline_mode<synchronous>, transform_indices = @transform_0, window_bounds = array<i64: 32, 64>}, {pipeline_mode = #tpu.pipeline_mode<synchronous>, transform_indices = @transform_1, window_bounds = array<i64: 3, 64, 256>}, {pipeline_mode = #tpu.pipeline_mode<synchronous>, transform_indices = @transform_2, window_bounds = array<i64: 64, 96>}, {pipeline_mode = #tpu.pipeline_mode<synchronous>, transform_indices = @transform_3, window_bounds = array<i64: 256, 256>}, {pipeline_mode = #tpu.pipeline_mode<synchronous>, transform_indices = @transform_4, window_bounds = array<i64: 1, 256>}, {pipeline_mode = #tpu.pipeline_mode<synchronous>, transform_indices = @transform_5, window_bounds = array<i64: 1, 256>}, {pipeline_mode = #tpu.pipeline_mode<synchronous>, transform_indices = @transform_6, window_bounds = array<i64: 64, 256>}]} {
    %c0 = arith.constant 0 : index
    %c0_0 = arith.constant 0 : index
    %0 = vector.load %arg1[%c0, %c0_0] : memref<32x64xbf16, #tpu.memory_space<vmem>>, vector<32x64xbf16>
    %c0_1 = arith.constant 0 : index
    %c0_2 = arith.constant 0 : index
    %c0_3 = arith.constant 0 : index
    %1 = vector.load %arg2[%c0_1, %c0_2, %c0_3] : memref<3x64x256xbf16, #tpu.memory_space<vmem>>, vector<1x64x256xbf16>
    %2 = vector.shape_cast %1 : vector<1x64x256xbf16> to vector<64x256xbf16>
    %cst = arith.constant dense<0.000000e+00> : vector<32x256xf32>
    %3 = tpu.matmul %0, %2, %cst {dimension_numbers = #tpu.dot_dimension_numbers<[1], [0], [0], [1], [0, 0, 1, 1], [], []>} : vector<32x64xbf16>, vector<64x256xbf16>, vector<32x256xf32> -> vector<32x256xf32>
    %c1 = arith.constant 1 : index
    %c0_4 = arith.constant 0 : index
    %c0_5 = arith.constant 0 : index
    %4 = vector.load %arg2[%c1, %c0_4, %c0_5] : memref<3x64x256xbf16, #tpu.memory_space<vmem>>, vector<1x64x256xbf16>
    %5 = vector.shape_cast %4 : vector<1x64x256xbf16> to vector<64x256xbf16>
    %cst_6 = arith.constant dense<0.000000e+00> : vector<32x256xf32>
    %6 = tpu.matmul %0, %5, %cst_6 {dimension_numbers = #tpu.dot_dimension_numbers<[1], [0], [0], [1], [0, 0, 1, 1], [], []>} : vector<32x64xbf16>, vector<64x256xbf16>, vector<32x256xf32> -> vector<32x256xf32>
    %c2 = arith.constant 2 : index
    %c0_7 = arith.constant 0 : index
    %c0_8 = arith.constant 0 : index
    %7 = vector.load %arg2[%c2, %c0_7, %c0_8] : memref<3x64x256xbf16, #tpu.memory_space<vmem>>, vector<1x64x256xbf16>
    %8 = vector.shape_cast %7 : vector<1x64x256xbf16> to vector<64x256xbf16>
    %cst_9 = arith.constant dense<0.000000e+00> : vector<32x256xf32>
    %9 = tpu.matmul %0, %8, %cst_9 {dimension_numbers = #tpu.dot_dimension_numbers<[1], [0], [0], [1], [0, 0, 1, 1], [], []>} : vector<32x64xbf16>, vector<64x256xbf16>, vector<32x256xf32> -> vector<32x256xf32>
    %10 = tpu.concatenate %3, %6, %9 in 0 : vector<32x256xf32>, vector<32x256xf32>, vector<32x256xf32> -> vector<96x256xf32>
    %c0_10 = arith.constant 0 : index
    %c0_11 = arith.constant 0 : index
    %11 = vector.load %arg3[%c0_10, %c0_11] : memref<64x96xf32, #tpu.memory_space<vmem>>, vector<64x96xf32>
    %cst_12 = arith.constant dense<0.000000e+00> : vector<64x256xf32>
    %12 = tpu.matmul %11, %10, %cst_12 {dimension_numbers = #tpu.dot_dimension_numbers<[1], [0], [0], [1], [0, 0, 1, 1], [], []>} : vector<64x96xf32>, vector<96x256xf32>, vector<64x256xf32> -> vector<64x256xf32>
    %cst_13 = arith.constant dense<0.000000e+00> : vector<256xf32>
    %13 = vector.multi_reduction <add>, %12, %cst_13 [0] : vector<64x256xf32> to vector<256xf32>
    %14 = vector.shape_cast %13 : vector<256xf32> to vector<1x256xf32>
    %15 = arith.mulf %12, %12 : vector<64x256xf32>
    %cst_14 = arith.constant dense<0.000000e+00> : vector<256xf32>
    %16 = vector.multi_reduction <add>, %15, %cst_14 [0] : vector<64x256xf32> to vector<256xf32>
    %17 = vector.shape_cast %16 : vector<256xf32> to vector<1x256xf32>
    %18 = tpu.concatenate %14, %17 in 0 : vector<1x256xf32>, vector<1x256xf32> -> vector<2x256xf32>
    %c0_15 = arith.constant 0 : index
    %c0_16 = arith.constant 0 : index
    %19 = vector.load %arg4[%c0_15, %c0_16] : memref<256x256xf32, #tpu.memory_space<vmem>>, vector<256x256xf32>
    %cst_17 = arith.constant dense<0.000000e+00> : vector<2x256xf32>
    %20 = tpu.matmul %18, %19, %cst_17 {dimension_numbers = #tpu.dot_dimension_numbers<[1], [0], [0], [1], [0, 0, 1, 1], [], []>} : vector<2x256xf32>, vector<256x256xf32>, vector<2x256xf32> -> vector<2x256xf32>
    %21 = vector.extract_strided_slice %20 {offsets = [0, 0], sizes = [1, 256], strides = [1, 1]} : vector<2x256xf32> to vector<1x256xf32>
    %cst_18 = arith.constant 4.8828125E-4 : f32
    %22 = vector.broadcast %cst_18 : f32 to vector<1x256xf32>
    %23 = arith.mulf %21, %22 : vector<1x256xf32>
    %24 = vector.extract_strided_slice %20 {offsets = [1, 0], sizes = [1, 256], strides = [1, 1]} : vector<2x256xf32> to vector<1x256xf32>
    %cst_19 = arith.constant 4.8828125E-4 : f32
    %25 = vector.broadcast %cst_19 : f32 to vector<1x256xf32>
    %26 = arith.mulf %24, %25 : vector<1x256xf32>
    %27 = arith.mulf %23, %23 : vector<1x256xf32>
    %28 = arith.subf %26, %27 : vector<1x256xf32>
    %cst_20 = arith.constant 0.000000e+00 : f32
    %29 = vector.broadcast %cst_20 : f32 to vector<1x256xf32>
    %30 = arith.maximumf %28, %29 : vector<1x256xf32>
    %c0_21 = arith.constant 0 : index
    %c0_22 = arith.constant 0 : index
    %31 = vector.load %arg5[%c0_21, %c0_22] : memref<1x256xf32, #tpu.memory_space<vmem>>, vector<1x256xf32>
    %cst_23 = arith.constant 9.99999974E-6 : f32
    %32 = vector.broadcast %cst_23 : f32 to vector<1x256xf32>
    %33 = arith.addf %30, %32 : vector<1x256xf32>
    %34 = math.rsqrt %33 : vector<1x256xf32>
    %35 = arith.mulf %31, %34 : vector<1x256xf32>
    %c0_24 = arith.constant 0 : index
    %c0_25 = arith.constant 0 : index
    %36 = vector.load %arg6[%c0_24, %c0_25] : memref<1x256xf32, #tpu.memory_space<vmem>>, vector<1x256xf32>
    %37 = arith.mulf %23, %35 : vector<1x256xf32>
    %38 = arith.subf %36, %37 : vector<1x256xf32>
    %39 = vector.broadcast %35 : vector<1x256xf32> to vector<64x256xf32>
    %40 = arith.mulf %12, %39 : vector<64x256xf32>
    %41 = vector.broadcast %38 : vector<1x256xf32> to vector<64x256xf32>
    %42 = arith.addf %40, %41 : vector<64x256xf32>
    %cst_26 = arith.constant 0.000000e+00 : f32
    %43 = vector.broadcast %cst_26 : f32 to vector<64x256xf32>
    %44 = arith.maximumf %42, %43 : vector<64x256xf32>
    %c0_27 = arith.constant 0 : index
    %c0_28 = arith.constant 0 : index
    %45 = vector.load %arg7[%c0_27, %c0_28] : memref<64x256xf32, #tpu.memory_space<vmem>>, vector<64x256xf32>
    tpu.vector_store %arg7[%c0_27, %c0_28], %44 {strides = array<i32>} : memref<64x256xf32, #tpu.memory_space<vmem>>, vector<64x256xf32>,
    return
  }
  func.func @transform_0(%arg0: i32) -> (i32, i32) {
    %c0_i32 = arith.constant 0 : i32
    %c0_i32_0 = arith.constant 0 : i32
    %c0_i32_1 = arith.constant 0 : i32
    return %c0_i32, %c0_i32_0 : i32, i32
  }
  func.func @transform_1(%arg0: i32) -> (i32, i32, i32) {
    %c0_i32 = arith.constant 0 : i32
    %c0_i32_0 = arith.constant 0 : i32
    %c0_i32_1 = arith.constant 0 : i32
    %c0_i32_2 = arith.constant 0 : i32
    return %c0_i32, %c0_i32_0, %c0_i32_1 : i32, i32, i32
  }
  func.func @transform_2(%arg0: i32) -> (i32, i32) {
    %c0_i32 = arith.constant 0 : i32
    %c0_i32_0 = arith.constant 0 : i32
    %c0_i32_1 = arith.constant 0 : i32
    return %c0_i32, %c0_i32_0 : i32, i32
  }
  func.func @transform_3(%arg0: i32) -> (i32, i32) {
    %c0_i32 = arith.constant 0 : i32
    %c0_i32_0 = arith.constant 0 : i32
    %c0_i32_1 = arith.constant 0 : i32
    return %c0_i32, %c0_i32_0 : i32, i32
  }
  func.func @transform_4(%arg0: i32) -> (i32, i32) {
    %c0_i32 = arith.constant 0 : i32
    %c0_i32_0 = arith.constant 0 : i32
    %c0_i32_1 = arith.constant 0 : i32
    return %c0_i32, %c0_i32_0 : i32, i32
  }
  func.func @transform_5(%arg0: i32) -> (i32, i32) {
    %c0_i32 = arith.constant 0 : i32
    %c0_i32_0 = arith.constant 0 : i32
    %c0_i32_1 = arith.constant 0 : i32
    return %c0_i32, %c0_i32_0 : i32, i32
  }
  func.func @transform_6(%arg0: i32) -> (i32, i32) {
    %c0_i32 = arith.constant 0 : i32
    %c0_i32_0 = arith.constant 0 : i32
    %c0_i32_1 = arith.constant 0 : i32
    return %c0_i32, %c0_i32_0 : i32, i32
  }
}

</mosaic_0001>

<bundles_post_ra>
// kernel: upblock_forward.1
= control target key start
LH: loop header
LB: loop body
LE: loop exit
PB: predicated region body
PF: predicated region fallthrough
CT: control target
= control target key end

     0   :  { %v954_v1 = vmov 0   ;;  %vm86_vm0 = vcmask 523264   ;;  %v955_v27 = vmov 0.0   ;;  %vm358_vm1 = vcmask 785408   ;;  %s1458_s1 = inlined_call_operand.vmem [shape: bf16[3,64,256], index: 1, kind: input, shape index: {}]   ;;  %s1459_s0 = inlined_call_operand.vmem [shape: bf16[32,64], index: 0, kind: input, shape index: {}]   ;;  %s1460_s3 = inlined_call_operand.vmem [shape: f32[256,256], index: 3, kind: input, shape index: {}]   ;;  %s1461_s2 = inlined_call_operand.vmem [shape: f32[64,96], index: 2, kind: input, shape index: {}]   ;;  %s1462_s4 = inlined_call_operand.vmem [shape: f32[1,256], index: 4, kind: input, shape index: {}]   ;;  %s1463_s5 = inlined_call_operand.vmem [shape: f32[1,256], index: 5, kind: input, shape index: {}]   ;;  %s1464_s6 = inlined_call_operand.vmem [shape: f32[64,256], index: 6, kind: output, shape index: {}]  }
   0x1   :  { %v912_v0 = vld [vmem:[%s1458_s1 + $0x34] ss:$8 sps:$4 sm:$0xff]   ;;  %125 = vmatprep.mubr.bf16.mxu1 %v954_v1  ;;  %329 = vmatprep.mubr.bf16.mxu0 %v954_v1  ;;  %v916_v3 = vld [vmem:[%s1458_s1 + $0x30] ss:$8 sps:$4 sm:$0xff]   ;;  %v918_v5 = vld [vmem:[%s1458_s1 + $0x24] ss:$8 sps:$4 sm:$0xff]  }
   0x2   :  { %v914_v2 = vld [vmem:[%s1458_s1 + $0xb4] ss:$8 sps:$4 sm:$0xff]   ;;  %101 = vmatprep.subr.bf16.mxu1 %v912_v0  ;;  %v917_v4 = vld [vmem:[%s1458_s1 + $0xb0] ss:$8 sps:$4 sm:$0xff]   ;;  %v920_v6 = vld [vmem:[%s1458_s1 + $0xa4] ss:$8 sps:$4 sm:$0xff]  }
   0x3   :  { %305 = vmatprep.subr.bf16.mxu0 %v914_v2  ;;  %102 = vmatpush1.bf16.msra.mxu1 %v916_v3  ;;  %v922_v7 = vld [vmem:[%s1458_s1 + $0x20] ss:$8 sps:$4 sm:$0xff]   ;;  %v924_v9 = vld [vmem:[%s1458_s1 + $0x14] ss:$8 sps:$4 sm:$0xff]   ;;  %v928_v11 = vld [vmem:[%s1458_s1 + $0x10] ss:$8 sps:$4 sm:$0xff]  }
   0x4   :  { %306 = vmatpush1.bf16.msra.mxu0 %v917_v4  ;;  %103 = vmatprep.subr.bf16.mxu1 %v918_v5  ;;  %v923_v8 = vld [vmem:[%s1458_s1 + $0xa0] ss:$8 sps:$4 sm:$0xff]   ;;  %v926_v10 = vld [vmem:[%s1458_s1 + $0x94] ss:$8 sps:$4 sm:$0xff]   ;;  %v929_v12 = vld [vmem:[%s1458_s1 + $0x90] ss:$8 sps:$4 sm:$0xff]  }
   0x5   :  { %307 = vmatprep.subr.bf16.mxu0 %v920_v6  ;;  %v930_v13 = vld [vmem:[%s1458_s1 + $0x4] ss:$8 sps:$4 sm:$0xff]   ;;  %v934_v15 = vld [vmem:[%s1458_s1] ss:$8 sps:$4 sm:$0xff]   ;;  %v939_v17 = vld [vmem:[%s1458_s1 + $0x74] ss:$8 sps:$4 sm:$0xff]  }
   0x6   :  { %v932_v14 = vld [vmem:[%s1458_s1 + $0x84] ss:$8 sps:$4 sm:$0xff]   ;;  %v935_v16 = vld [vmem:[%s1458_s1 + $0x80] ss:$8 sps:$4 sm:$0xff]   ;;  %v937_v19 = vld [vmem:[%s1458_s1 + $0x70] ss:$8 sps:$4 sm:$0xff]  }
   0x7   :  { %104 = vmatpush1.bf16.msra.mxu1 %v922_v7  ;;  %v936_v18 = vld [vmem:[%s1459_s0] sm:$0xff]   ;;  %v946_v22 = vld [vmem:[%s1458_s1 + $0x54] ss:$8 sps:$4 sm:$0xff]   ;;  %v943_v23 = vld [vmem:[%s1459_s0 + $0x8] sm:$0xff]   ;;  %vm564_vm2 = vcmask 1040384  }
   0x8   :  { %308 = vmatpush1.bf16.msra.mxu0 %v923_v8  ;;  %105 = vmatprep.subr.bf16.mxu1 %v924_v9  ;;  %v942_v20 = vld [vmem:[%s1458_s1 + $0x64] ss:$8 sps:$4 sm:$0xff]   ;;  %v940_v21 = vld [vmem:[%s1458_s1 + $0x60] ss:$8 sps:$4 sm:$0xff]   ;;  %v944_v24 = vld [vmem:[%s1458_s1 + $0x50] ss:$8 sps:$4 sm:$0xff]  }
   0x9   :  { %309 = vmatprep.subr.bf16.mxu0 %v926_v10  ;;  %v949_v25 = vld [vmem:[%s1458_s1 + $0x44] ss:$8 sps:$4 sm:$0xff]   ;;  %v947_v26 = vld [vmem:[%s1458_s1 + $0x40] ss:$8 sps:$4 sm:$0xff]   ;;  %v598_v28 = vld [vmem:[%s1460_s3 + $0xf8] sm:$0xff] }
   0xa   :  { %v597_v29 = vld [vmem:[%s1460_s3 + $0xf0] sm:$0xff]  ;;  %v596_v30 = vld [vmem:[%s1460_s3 + $0xe8] sm:$0xff]  ;;  %v595_v31 = vld [vmem:[%s1460_s3 + $0xe0] sm:$0xff] }
   0xb   :  { %106 = vmatpush1.bf16.msra.mxu1 %v928_v11  ;;  %v594_v32 = vld [vmem:[%s1460_s3 + $0xd8] sm:$0xff]  ;;  %v593_v33 = vld [vmem:[%s1460_s3 + $0xd0] sm:$0xff]  ;;  %v592_v34 = vld [vmem:[%s1460_s3 + $0xc8] sm:$0xff] }
   0xc   :  { %310 = vmatpush1.bf16.msra.mxu0 %v929_v12  ;;  %107 = vmatprep.subr.bf16.mxu1 %v930_v13  ;;  %v591_v35 = vld [vmem:[%s1460_s3 + $0xc0] sm:$0xff]  ;;  %v590_v36 = vld [vmem:[%s1460_s3 + $0xb8] sm:$0xff]  ;;  %v589_v37 = vld [vmem:[%s1460_s3 + $0xb0] sm:$0xff] }
   0xd   :  { %311 = vmatprep.subr.bf16.mxu0 %v932_v14  ;;  %v588_v38 = vld [vmem:[%s1460_s3 + $0xa8] sm:$0xff]  ;;  %v587_v39 = vld [vmem:[%s1460_s3 + $0xa0] sm:$0xff]  ;;  %v586_v40 = vld [vmem:[%s1460_s3 + $0x98] sm:$0xff] }
   0xe   :  { %v585_v41 = vld [vmem:[%s1460_s3 + $0x90] sm:$0xff]  ;;  %v584_v42 = vld [vmem:[%s1460_s3 + $0x88] sm:$0xff]  ;;  %v350_v3 = vld [vmem:[%s1461_s2] sm:$0xff] }
   0xf   :  { %108 = vmatpush1.bf16.msra.mxu1 %v934_v15  ;;  %v351_v4 = vld [vmem:[%s1461_s2 + $0x8] sm:$0xff]  ;;  %v352_v5 = vld [vmem:[%s1461_s2 + $0x10] sm:$0xff]  ;;  %v353_v6 = vld [vmem:[%s1461_s2 + $0x18] sm:$0xff] }
  0x10   :  { %312 = vmatpush1.bf16.msra.mxu0 %v935_v16  ;;  %203 = vmatprep.subr.bf16.mxu1 %v939_v17  ;;  %v354_v7 = vld [vmem:[%s1461_s2 + $0x20] sm:$0xff]  ;;  %v355_v8 = vld [vmem:[%s1461_s2 + $0x28] sm:$0xff]  ;;  %v356_v9 = vld [vmem:[%s1461_s2 + $0x30] sm:$0xff] }
  0x11   :  { %631 = vmatprep.subr.mxu0 %v598_v28  ;;  %v357_v10 = vld [vmem:[%s1461_s2 + $0x38] sm:$0xff]  ;;  %v583_v11 = vld [vmem:[%s1460_s3 + $0x80] sm:$0xff]  ;;  %v581_v13 = vld [vmem:[%s1460_s3 + $0x70] sm:$0xff] }
  0x12   :  { %863 = vmatmul.mubr.msk.bf16.vlgmr.msra.gmra.mxu1 %vm86_vm0, %v936_v18  ;;  %v582_v12 = vld [vmem:[%s1460_s3 + $0x78] sm:$0xff]  ;;  %v580_v14 = vld [vmem:[%s1460_s3 + $0x68] sm:$0xff]  ;;  %v579_v15 = vld [vmem:[%s1460_s3 + $0x60] sm:$0xff] }
  0x13   :  { %899 = vmatmul.mubr.msk.bf16.vlgmr.msra.gmra.mxu0 %vm86_vm0, %v936_v18  ;;  %204 = vmatpush1.bf16.msra.mxu1 %v937_v19  ;;  %v578_v16 = vld [vmem:[%s1460_s3 + $0x58] sm:$0xff]  ;;  %v577_v17 = vld [vmem:[%s1460_s3 + $0x50] sm:$0xff]  ;;  %v575_v19 = vld [vmem:[%s1460_s3 + $0x40] sm:$0xff] }
  0x14   :  { %135 = vmatprep.mubr.bf16.mxu1 %v954_v1  ;;  %205 = vmatprep.subr.bf16.mxu1 %v942_v20  ;;  %v574_v20 = vld [vmem:[%s1460_s3 + $0x38] sm:$0xff] }
  0x15   :  { %339 = vmatprep.mubr.bf16.mxu0 %v954_v1  ;;  %632 = vmatpush1.msra.mxu0 %v597_v29  ;;  %v630_v28 = vld [vmem:[%s1460_s3 + $0x1f8] sm:$0xff]  ;;  %v629_v29 = vld [vmem:[%s1460_s3 + $0x1f0] sm:$0xff] }
  0x16   :  { %633 = vmatprep.subr.mxu0 %v596_v30  ;;  %v628_v30 = vld [vmem:[%s1460_s3 + $0x1e8] sm:$0xff] }
  0x17   :  { %206 = vmatpush1.bf16.msra.mxu1 %v940_v21  ;;  %634 = vmatpush1.msra.mxu0 %v595_v31  ;;  %v573_v21 = vld [vmem:[%s1460_s3 + $0x30] sm:$0xff]  ;;  %v627_v31 = vld [vmem:[%s1460_s3 + $0x1e0] sm:$0xff] }
  0x18   :  { %207 = vmatprep.subr.bf16.mxu1 %v946_v22  ;;  %635 = vmatprep.subr.mxu0 %v594_v32  ;;  %v572_v22 = vld [vmem:[%s1460_s3 + $0x28] sm:$0xff]  ;;  %v626_v32 = vld [vmem:[%s1460_s3 + $0x1d8] sm:$0xff] }
  0x19   :  { %636 = vmatpush1.msra.mxu0 %v593_v33  ;;  %v625_v33 = vld [vmem:[%s1460_s3 + $0x1d0] sm:$0xff] }
  0x1a   :  { %864 = vmatmul.mubr.msk.bf16.gmra.mxu1 %vm86_vm0, %v943_v23  ;;  %637 = vmatprep.subr.mxu0 %v592_v34  ;;  %v624_v34 = vld [vmem:[%s1460_s3 + $0x1c8] sm:$0xff] }
  0x1b   :  { %900 = vmatmul.mubr.msk.bf16.gmra.mxu0 %vm86_vm0, %v943_v23  ;;  %208 = vmatpush1.bf16.msra.mxu1 %v944_v24  ;;  %v570_v24 = vld [vmem:[%s1460_s3 + $0x18] sm:$0xff] }
  0x1c   :  { %227 = vmatprep.mubr.bf16.mxu1 %v954_v1  ;;  %209 = vmatprep.subr.bf16.mxu1 %v949_v25  ;;  %v569_v25 = vld [vmem:[%s1460_s3 + $0x10] sm:$0xff] }
  0x1d   :  { %638 = vmatpush1.msra.mxu0 %v591_v35  ;;  %v623_v35 = vld [vmem:[%s1460_s3 + $0x1c0] sm:$0xff] }
  0x1e   :  { %639 = vmatprep.subr.mxu0 %v590_v36  ;;  %v622_v36 = vld [vmem:[%s1460_s3 + $0x1b8] sm:$0xff] }
  0x1f   :  { %210 = vmatpush1.bf16.msra.mxu1 %v947_v26  ;;  %640 = vmatpush1.msra.mxu0 %v589_v37  ;;  %v568_v26 = vld [vmem:[%s1460_s3 + $0x8] sm:$0xff]  ;;  %v621_v37 = vld [vmem:[%s1460_s3 + $0x1b0] sm:$0xff] }
  0x20   :  { %641 = vmatprep.subr.mxu0 %v588_v38  ;;  %v620_v38 = vld [vmem:[%s1460_s3 + $0x1a8] sm:$0xff] }
  0x21   :  { %642 = vmatpush1.msra.mxu0 %v587_v39  ;;  %v619_v39 = vld [vmem:[%s1460_s3 + $0x1a0] sm:$0xff] }
  0x22   :  { %881 = vmatmul.mubr.msk.bf16.vlgmr.msra.gmra.mxu1 %vm86_vm0, %v936_v18  ;;  %643 = vmatprep.subr.mxu0 %v586_v40  ;;  %v576_v18 = vld [vmem:[%s1460_s3 + $0x48] sm:$0xff]  ;;  %v618_v40 = vld [vmem:[%s1460_s3 + $0x198] sm:$0xff] }
  0x23   :  { %237 = vmatprep.mubr.bf16.mxu1 %v954_v1  ;;  %644 = vmatpush1.msra.mxu0 %v585_v41  ;;  %v617_v41 = vld [vmem:[%s1460_s3 + $0x190] sm:$0xff] }
  0x24   :  { %645 = vmatprep.subr.mxu0 %v584_v42  ;;  %v616_v42 = vld [vmem:[%s1460_s3 + $0x188] sm:$0xff] }
  0x25   :  { %646 = vmatpush1.msra.mxu0 %v583_v11 }
  0x26   :  { %647 = vmatprep.subr.mxu0 %v582_v12 }
  0x27   :  { %648 = vmatpush1.msra.mxu0 %v581_v13 }
  0x28   :  { %649 = vmatprep.subr.mxu0 %v580_v14 }
  0x29   :  { %650 = vmatpush1.msra.mxu0 %v579_v15 }
  0x2a   :  { %882 = vmatmul.mubr.msk.bf16.gmra.mxu1 %vm86_vm0, %v943_v23  ;;  %651 = vmatprep.subr.mxu0 %v578_v16  ;;  %v571_v23 = vld [vmem:[%s1460_s3 + $0x20] sm:$0xff] }
  0x2b   :  { %447 = vmatprep.mubr.f32.mxu1 %v955_v27  ;;  %652 = vmatpush1.msra.mxu0 %v577_v17 }
  0x2c   :  { %653 = vmatprep.subr.mxu0 %v576_v18 }
  0x2d   :  { %654 = vmatpush1.msra.mxu0 %v575_v19 }
  0x2e   :  { %655 = vmatprep.subr.mxu0 %v574_v20 }
  0x2f   :  { %656 = vmatpush1.msra.mxu0 %v573_v21 }
  0x30   :  { %657 = vmatprep.subr.mxu0 %v572_v22 }
  0x31   :  { %658 = vmatpush1.msra.mxu0 %v571_v23 }
  0x32   :  { %659 = vmatprep.subr.mxu0 %v570_v24 }
  0x33   :  { %660 = vmatpush1.msra.mxu0 %v569_v25 }
  0x34   :  { %661 = vmatprep.subr.mxu0 %v568_v26 }
  0xd2   :  { %v127_v43 = vpop.f32.mrf.mxu1 }
  0xd3   :  { %v331_v44 = vpop.f32.mrf.mxu0 }
  0xd4   :  { %v129_v45 = vpop.f32.mrf.mxu1 }
  0xd5   :  { %v333_v46 = vpop.f32.mrf.mxu0 }
  0xd6   :  { %v131_v47 = vpop.f32.mrf.mxu1 }
  0xd7   :  { %v335_v48 = vpop.f32.mrf.mxu0 }
  0xd8   :  { %v133_v49 = vpop.f32.mrf.mxu1 }
  0xd9   :  { %v337_v50 = vpop.f32.mrf.mxu0 }
  0xda   :  { %v137_v51 = vpop.f32.mrf.mxu1 }
  0xdb   :  { %v341_v52 = vpop.f32.mrf.mxu0 }
  0xdc   :  { %v139_v53 = vpop.f32.mrf.mxu1 }
  0xdd   :  { %v343_v54 = vpop.f32.mrf.mxu0 }
  0xde   :  { %v141_v55 = vpop.f32.mrf.mxu1 }
  0xdf   :  { %v345_v56 = vpop.f32.mrf.mxu0 }
  0xe0   :  { %v143_v57 = vpop.f32.mrf.mxu1 }
  0xe1   :  { %v347_v58 = vpop.f32.mrf.mxu0 }
  0xe2   :  { %391 = vmatprep.subr.mxu1 %v347_v58  ;;  %v229_v59 = vpop.f32.mrf.mxu1  ;;  %v600_v58 = vld [vmem:[%s1460_s3 + $0x108] sm:$0xff] }
  0xe3   :  { %392 = vmatpush1.msra.mxu1 %v345_v56  ;;  %v602_v56 = vld [vmem:[%s1460_s3 + $0x118] sm:$0xff] }
  0xe4   :  { %393 = vmatprep.subr.mxu1 %v343_v54  ;;  %v231_v60 = vpop.f32.mrf.mxu1  ;;  %v604_v54 = vld [vmem:[%s1460_s3 + $0x128] sm:$0xff] }
  0xe5   :  { %394 = vmatpush1.msra.mxu1 %v341_v52  ;;  %v606_v52 = vld [vmem:[%s1460_s3 + $0x138] sm:$0xff] }
  0xe6   :  { %395 = vmatprep.subr.mxu1 %v337_v50  ;;  %v233_v61 = vpop.f32.mrf.mxu1  ;;  %v608_v50 = vld [vmem:[%s1460_s3 + $0x148] sm:$0xff] }
  0xe7   :  { %396 = vmatpush1.msra.mxu1 %v335_v48  ;;  %v610_v48 = vld [vmem:[%s1460_s3 + $0x158] sm:$0xff] }
  0xe8   :  { %397 = vmatprep.subr.mxu1 %v333_v46  ;;  %v235_v62 = vpop.f32.mrf.mxu1  ;;  %v612_v46 = vld [vmem:[%s1460_s3 + $0x168] sm:$0xff] }
  0xe9   :  { %398 = vmatpush1.msra.mxu1 %v331_v44  ;;  %v614_v44 = vld [vmem:[%s1460_s3 + $0x178] sm:$0xff] }
  0xea   :  { %v239_v63 = vpop.f32.mrf.mxu1 }
  0xec   :  { %v241_v0 = vpop.f32.mrf.mxu1 }
  0xee   :  { %v243_v1 = vpop.f32.mrf.mxu1 }
  0xf0   :  { %v245_v2 = vpop.f32.mrf.mxu1 }
  0xf1   :  { %399 = vmatprep.subr.mxu1 %v245_v2 }
  0xf2   :  { %400 = vmatpush1.msra.mxu1 %v243_v1 }
  0xf3   :  { %401 = vmatprep.subr.mxu1 %v241_v0 }
  0xf4   :  { %402 = vmatpush1.msra.mxu1 %v239_v63 }
  0xf5   :  { %403 = vmatprep.subr.mxu1 %v235_v62 }
  0xf6   :  { %404 = vmatpush1.msra.mxu1 %v233_v61 }
  0xf7   :  { %405 = vmatprep.subr.mxu1 %v231_v60 }
  0xf8   :  { %406 = vmatpush1.msra.mxu1 %v229_v59  ;;  %v599_v59 = vld [vmem:[%s1460_s3 + $0x100] sm:$0xff] }
  0xf9   :  { %407 = vmatprep.subr.mxu1 %v143_v57  ;;  %v601_v57 = vld [vmem:[%s1460_s3 + $0x110] sm:$0xff] }
  0xfa   :  { %408 = vmatpush1.msra.mxu1 %v141_v55  ;;  %v603_v55 = vld [vmem:[%s1460_s3 + $0x120] sm:$0xff] }
  0xfb   :  { %409 = vmatprep.subr.mxu1 %v139_v53  ;;  %v605_v53 = vld [vmem:[%s1460_s3 + $0x130] sm:$0xff] }
  0xfc   :  { %410 = vmatpush1.msra.mxu1 %v137_v51  ;;  %v607_v51 = vld [vmem:[%s1460_s3 + $0x140] sm:$0xff] }
  0xfd   :  { %411 = vmatprep.subr.mxu1 %v133_v49  ;;  %v609_v49 = vld [vmem:[%s1460_s3 + $0x150] sm:$0xff] }
  0xfe   :  { %412 = vmatpush1.msra.mxu1 %v131_v47  ;;  %v611_v47 = vld [vmem:[%s1460_s3 + $0x160] sm:$0xff] }
  0xff   :  { %413 = vmatprep.subr.mxu1 %v129_v45  ;;  %v613_v45 = vld [vmem:[%s1460_s3 + $0x170] sm:$0xff] }
 0x100   :  { %414 = vmatpush1.msra.mxu1 %v127_v43  ;;  %v615_v43 = vld [vmem:[%s1460_s3 + $0x180] sm:$0xff] }
 0x101   :  { %901 = vmatmul.mubr.msk.f32.vlgmr.msra.gmra.mxu1 %vm358_vm1, %v350_v3 }
 0x102   :  { %453 = vmatprep.mubr.f32.mxu1 %v955_v27 }
 0x105   :  { %902 = vmatmul.mubr.msk.f32.gmra.mxu1 %vm358_vm1, %v351_v4 }
 0x106   :  { %459 = vmatprep.mubr.f32.mxu1 %v955_v27 }
 0x109   :  { %903 = vmatmul.mubr.msk.f32.gmra.mxu1 %vm358_vm1, %v352_v5 }
 0x10a   :  { %465 = vmatprep.mubr.f32.mxu1 %v955_v27 }
 0x10d   :  { %904 = vmatmul.mubr.msk.f32.gmra.mxu1 %vm358_vm1, %v353_v6 }
 0x10e   :  { %471 = vmatprep.mubr.f32.mxu1 %v955_v27 }
 0x111   :  { %905 = vmatmul.mubr.msk.f32.gmra.mxu1 %vm358_vm1, %v354_v7 }
 0x112   :  { %477 = vmatprep.mubr.f32.mxu1 %v955_v27 }
 0x115   :  { %906 = vmatmul.mubr.msk.f32.gmra.mxu1 %vm358_vm1, %v355_v8 }
 0x116   :  { %483 = vmatprep.mubr.f32.mxu1 %v955_v27 }
 0x119   :  { %907 = vmatmul.mubr.msk.f32.gmra.mxu1 %vm358_vm1, %v356_v9 }
 0x11a   :  { %489 = vmatprep.mubr.f32.mxu1 %v955_v27  ;;  %v567_v27 = vld [vmem:[%s1460_s3] sm:$0xff] }
 0x11b   :  { %662 = vmatpush1.msra.mxu0 %v567_v27 }
 0x11c   :  { %663 = vmatprep.subr.mxu0 %v630_v28 }
 0x11d   :  { %908 = vmatmul.mubr.msk.f32.gmra.mxu1 %vm358_vm1, %v357_v10  ;;  %664 = vmatpush2.msra.mxu0 %v629_v29 }
 0x11e   :  { %665 = vmatprep.subr.mxu0 %v628_v30 }
 0x11f   :  { %666 = vmatpush2.msra.mxu0 %v627_v31 }
 0x120   :  { %667 = vmatprep.subr.mxu0 %v626_v32 }
 0x121   :  { %668 = vmatpush2.msra.mxu0 %v625_v33 }
 0x122   :  { %669 = vmatprep.subr.mxu0 %v624_v34 }
 0x123   :  { %670 = vmatpush2.msra.mxu0 %v623_v35 }
 0x124   :  { %671 = vmatprep.subr.mxu0 %v622_v36 }
 0x125   :  { %672 = vmatpush2.msra.mxu0 %v621_v37 }
 0x126   :  { %673 = vmatprep.subr.mxu0 %v620_v38 }
 0x127   :  { %674 = vmatpush2.msra.mxu0 %v619_v39 }
 0x128   :  { %675 = vmatprep.subr.mxu0 %v618_v40 }
 0x129   :  { %676 = vmatpush2.msra.mxu0 %v617_v41 }
 0x12a   :  { %677 = vmatprep.subr.mxu0 %v616_v42 }
 0x12b   :  { %678 = vmatpush2.msra.mxu0 %v615_v43 }
 0x12c   :  { %679 = vmatprep.subr.mxu0 %v614_v44 }
 0x12d   :  { %680 = vmatpush2.msra.mxu0 %v613_v45 }
 0x12e   :  { %681 = vmatprep.subr.mxu0 %v612_v46 }
 0x12f   :  { %682 = vmatpush2.msra.mxu0 %v611_v47 }
 0x130   :  { %683 = vmatprep.subr.mxu0 %v610_v48 }
 0x131   :  { %684 = vmatpush2.msra.mxu0 %v609_v49 }
 0x132   :  { %685 = vmatprep.subr.mxu0 %v608_v50 }
 0x133   :  { %686 = vmatpush2.msra.mxu0 %v607_v51 }
 0x134   :  { %687 = vmatprep.subr.mxu0 %v606_v52 }
 0x135   :  { %688 = vmatpush2.msra.mxu0 %v605_v53 }
 0x136   :  { %689 = vmatprep.subr.mxu0 %v604_v54 }
 0x137   :  { %690 = vmatpush2.msra.mxu0 %v603_v55 }
 0x138   :  { %691 = vmatprep.subr.mxu0 %v602_v56 }
 0x139   :  { %692 = vmatpush2.msra.mxu0 %v601_v57 }
 0x13a   :  { %693 = vmatprep.subr.mxu0 %v600_v58 }
 0x13b   :  { %694 = vmatpush2.msra.mxu0 %v599_v59 }
 0x1c1   :  { %v1308_v60 = vpop.f32.mrf.mxu1 }
 0x1c2   :  { %v522_v7 = vmul.f32 %v1308_v60, %v1308_v60 }
 0x1c3   :  { %v1310_v61 = vpop.f32.mrf.mxu1 }
 0x1c4   :  { %v523_v10 = vmul.f32 %v1310_v61, %v1310_v61 }
 0x1c5   :  { %v1312_v62 = vpop.f32.mrf.mxu1 }
 0x1c6   :  { %v524_v4 = vmul.f32 %v1312_v62, %v1312_v62  ;;  %v496_v8 = vadd.f32 %v1312_v62, %v1308_v60 }
 0x1c7   :  { %v1314_v63 = vpop.f32.mrf.mxu1 }
 0x1c8   :  { %v525_v5 = vmul.f32 %v1314_v63, %v1314_v63  ;;  %v538_v13 = vadd.f32 %v524_v4, %v522_v7  ;;  %v509_v14 = vadd.f32 %v1314_v63, %v1310_v61 }
 0x1c9   :  { %v1316_v0 = vpop.f32.mrf.mxu1 }
 0x1ca   :  { %v526_v9 = vmul.f32 %v1316_v0, %v1316_v0  ;;  %v497_v15 = vadd.f32 %v496_v8, %v1316_v0  ;;  %v551_v17 = vadd.f32 %v525_v5, %v523_v10 }
 0x1cb   :  { %v1318_v1 = vpop.f32.mrf.mxu1 }
 0x1cc   :  { %v527_v11 = vmul.f32 %v1318_v1, %v1318_v1  ;;  %v539_v20 = vadd.f32 %v538_v13, %v526_v9  ;;  %v510_v21 = vadd.f32 %v509_v14, %v1318_v1 }
 0x1cd   :  { %v1320_v2 = vpop.f32.mrf.mxu1 }
 0x1ce   :  { %v528_v16 = vmul.f32 %v1320_v2, %v1320_v2  ;;  %v498_v22 = vadd.f32 %v497_v15, %v1320_v2  ;;  %v552_v24 = vadd.f32 %v551_v17, %v527_v11 }
 0x1cf   :  { %v1322_v3 = vpop.f32.mrf.mxu1 }
 0x1d0   :  { %v529_v18 = vmul.f32 %v1322_v3, %v1322_v3  ;;  %v540_v27 = vadd.f32 %v539_v20, %v528_v16  ;;  %v511_v28 = vadd.f32 %v510_v21, %v1322_v3 }
 0x1d1   :  { %v1328_v6 = vpop.f32.mrf.mxu1 }
 0x1d2   :  { %v530_v23 = vmul.f32 %v1328_v6, %v1328_v6  ;;  %v499_v29 = vadd.f32 %v498_v22, %v1328_v6  ;;  %v553_v31 = vadd.f32 %v552_v24, %v529_v18 }
 0x1d3   :  { %v1340_v12 = vpop.f32.mrf.mxu1 }
 0x1d4   :  { %v531_v25 = vmul.f32 %v1340_v12, %v1340_v12  ;;  %v541_v34 = vadd.f32 %v540_v27, %v530_v23  ;;  %v512_v35 = vadd.f32 %v511_v28, %v1340_v12 }
 0x1d5   :  { %v1349_v19 = vpop.f32.mrf.mxu1 }
 0x1d6   :  { %v532_v30 = vmul.f32 %v1349_v19, %v1349_v19  ;;  %v500_v36 = vadd.f32 %v499_v29, %v1349_v19  ;;  %v554_v38 = vadd.f32 %v553_v31, %v531_v25 }
 0x1d7   :  { %v1357_v26 = vpop.f32.mrf.mxu1 }
 0x1d8   :  { %v533_v32 = vmul.f32 %v1357_v26, %v1357_v26  ;;  %v542_v40 = vadd.f32 %v541_v34, %v532_v30  ;;  %v513_v41 = vadd.f32 %v512_v35, %v1357_v26 }
 0x1d9   :  { %v1365_v33 = vpop.f32.mrf.mxu1 }
 0x1da   :  { %v534_v37 = vmul.f32 %v1365_v33, %v1365_v33  ;;  %v501_v42 = vadd.f32 %v500_v36, %v1365_v33  ;;  %v555_v44 = vadd.f32 %v554_v38, %v533_v32 }
 0x1db   :  { %v1371_v39 = vpop.f32.mrf.mxu1 }
 0x1dc   :  { %v535_v43 = vmul.f32 %v1371_v39, %v1371_v39  ;;  %v543_v46 = vadd.f32 %v542_v40, %v534_v37  ;;  %v514_v47 = vadd.f32 %v513_v41, %v1371_v39 }
 0x1dd   :  { %v1377_v45 = vpop.f32.mrf.mxu1 }
 0x1de   :  { %v502_v48 = vadd.f32 %v501_v42, %v1377_v45  ;;  %v536_v49 = vmul.f32 %v1377_v45, %v1377_v45  ;;  %v556_v50 = vadd.f32 %v555_v44, %v535_v43 }
 0x1df   :  { %v1383_v51 = vpop.f32.mrf.mxu1 }
 0x1e0   :  { %v503_v52 = vrot.slane %v502_v48, 4  ;;  %v544_v53 = vadd.f32 %v543_v46, %v536_v49  ;;  %v515_v54 = vadd.f32 %v514_v47, %v1383_v51  ;;  %v537_v55 = vmul.f32 %v1383_v51, %v1383_v51 }
 0x1e1   :  { %v956_v47 = vmov 1966171168   ;;  %v727_v49 = vlaneseq }
 0x1e2   :  { %v504_v56 = vadd.f32 %v503_v52, %v502_v48  ;;  %v545_v57 = vrot.slane %v544_v53, 4  ;;  %v516_v58 = vrot.slane %v515_v54, 4  ;;  %v557_v59 = vadd.f32 %v556_v50, %v537_v55 }
 0x1e3   :  { %v725_v48 = vunpack.c.l.s4 %v956_v47  ;;  %v728_v52 = vshrl.u32 %v727_v49, 7 }
 0x1e4   :  { %v505_v4 = vrot.slane %v504_v56, 2  ;;  %v546_v5 = vadd.f32 %v545_v57, %v544_v53  ;;  %v517_v7 = vadd.f32 %v516_v58, %v515_v54  ;;  %v558_v8 = vrot.slane %v557_v59, 4 }
 0x1e5   :  { %v726_v50 = vunpack.c.0.s8 %v725_v48 }
 0x1e6   :  { %v547_v9 = vrot.slane %v546_v5, 2  ;;  %v518_v10 = vrot.slane %v517_v7, 2  ;;  %v559_v11 = vadd.f32 %v558_v8, %v557_v59  ;;  %v506_v13 = vadd.f32 %v505_v4, %v504_v56  ;;  %v716_v59 = vld [vmem:[%s1462_s4] sm:$0x3] }
 0x1e7   :  { %v729_v54 = vsub.s32 %v726_v50, %v728_v52 }
 0x1e8   :  { %v548_v14 = vadd.f32 %v547_v9, %v546_v5  ;;  %v519_v15 = vadd.f32 %v518_v10, %v517_v7  ;;  %v560_v16 = vrot.slane %v559_v11, 2  ;;  %v507_v21 = vrot.slane %v506_v13, 1 }
 0x1e9   :  { %v745_v5 = vsub.s32 0, %v728_v52  ;;  %v749_v7 = vsub.s32 1, %v728_v52 }
 0x1ea   :  { %v549_v17 = vrot.slane %v548_v14, 1  ;;  %v520_v18 = vrot.slane %v519_v15, 1  ;;  %v561_v20 = vadd.f32 %v560_v16, %v559_v11  ;;  %v508_v27 = vadd.f32 %v507_v21, %v506_v13  ;;  %v741_v16 = vld [vmem:[%s1463_s5] sm:$0x3] }
 0x1ec   :  { %v562_v22 = vrot.slane %v561_v20, 1  ;;  %v550_v23 = vadd.f32 %v549_v17, %v548_v14  ;;  %v521_v24 = vadd.f32 %v520_v18, %v519_v15 }
 0x1ee   :  { %v563_v25 = vadd.f32 %v562_v22, %v561_v20  ;;  %v565_v29 = vsel %vm564_vm2, %v508_v27, %v550_v23 }
 0x1f0   :  { %v566_v28 = vsel %vm564_vm2, %v521_v24, %v563_v25 }
 0x1f1   :  { %695 = vmatprep.mubr.f32.mxu0 %v566_v28 }
 0x1f2   :  { %696 = vmatmul.mubr.f32.vlgmr.msra.gmra.mxu0 %v565_v29 }
 0x2b2   :  { %v697_v30 = vpop.f32.mrf.mxu0 }
 0x2b3   :  { %v702_v31 = vmul.f32 0.00048828125, %v697_v30 }
 0x2b4   :  { %v699_v32 = vpop.f32.mrf.mxu0 }
 0x2b5   :  { %v704_v34 = vmul.f32 %v702_v31, %v702_v31  ;;  %v703_v35 = vmul.f32 0.00048828125, %v699_v32 }
 0x2b7   :  { %v708_v36 = vrot.slane %v704_v34, 7  ;;  %v705_v37 = vmul.f32 %v703_v35, %v703_v35 }
 0x2b9   :  { %v712_v38 = vsub.f32 %v702_v31, %v708_v36  ;;  %v709_v40 = vrot.slane %v705_v37, 7 }
 0x2bb   :  { %v714_v41 = vmax.f32 %v712_v38, 0.0  ;;  %v713_v42 = vsub.f32 %v703_v35, %v709_v40 }
 0x2bd   :  { %v717_v43 = vadd.f32 1e-05, %v714_v41  ;;  %v715_v44 = vmax.f32 %v713_v42, 0.0 }
 0x2bf   :  { %v718_v46 = vadd.f32 1e-05, %v715_v44  ;;  %950 = vrsqrt.f32 %v717_v43 }
 0x2c1   :  { %952 = vrsqrt.f32 %v718_v46 }
 0x2cc   :  { %v951_v53 = vpop.eup %950 }
 0x2ce   :  { %v953_v55 = vpop.eup %952 }
 0x2cf   :  { %v723_v56 = vcombine.low %v951_v53, %v953_v55 }
 0x2d1   :  { %v730_v57 = vrot.slane %v723_v56, %v729_v54 }
 0x2d3   :  { %v731_v58 = vcombine.high %v730_v57, %v730_v57 }
 0x2d5   :  { %v738_v4 = vrot.slane %v731_v58, %v729_v54 }
 0x2d7   :  { %v740_v8 = vmul.f32 %v738_v4, %v716_v59 }
 0x2d9   :  { %v746_v9 = vrot.slane %v740_v8, %v745_v5  ;;  %v750_v10 = vrot.slane %v740_v8, %v749_v7 }
 0x2db   :  { %v753_v11 = vmul.f32 %v746_v9, %v702_v31  ;;  %v754_v13 = vmul.f32 %v750_v10, %v703_v35  ;;  %v774_v18 = vmul.f32 %v746_v9, %v1308_v60  ;;  %v775_v20 = vmul.f32 %v750_v10, %v1310_v61 }
 0x2dc   :  { %v776_v21 = vmul.f32 %v746_v9, %v1312_v62  ;;  %v777_v23 = vmul.f32 %v750_v10, %v1314_v63  ;;  %v778_v24 = vmul.f32 %v746_v9, %v1316_v0  ;;  %v779_v25 = vmul.f32 %v750_v10, %v1318_v1 }
 0x2dd   :  { %v757_v14 = vcombine.low %v753_v11, %v754_v13  ;;  %v780_v27 = vmul.f32 %v746_v9, %v1320_v2  ;;  %v781_v28 = vmul.f32 %v750_v10, %v1322_v3  ;;  %v782_v29 = vmul.f32 %v746_v9, %v1328_v6 }
 0x2de   :  { %v783_v30 = vmul.f32 %v750_v10, %v1340_v12  ;;  %v784_v60 = vmul.f32 %v746_v9, %v1349_v19  ;;  %v785_v61 = vmul.f32 %v750_v10, %v1357_v26  ;;  %v786_v63 = vmul.f32 %v746_v9, %v1365_v33 }
 0x2df   :  { %v764_v15 = vrot.slane %v757_v14, %v729_v54  ;;  %v787_v0 = vmul.f32 %v750_v10, %v1371_v39  ;;  %v788_v1 = vmul.f32 %v746_v9, %v1377_v45  ;;  %v789_v2 = vmul.f32 %v750_v10, %v1383_v51 }
 0x2e1   :  { %v771_v17 = vrot.slane %v764_v15, %v729_v54 }
 0x2e3   :  { %v773_v22 = vsub.f32 %v741_v16, %v771_v17 }
 0x2e5   :  { %v794_v62 = vrot.slane %v773_v22, %v745_v5  ;;  %v798_v31 = vrot.slane %v773_v22, %v749_v7 }
 0x2e7   :  { %v801_v32 = vadd.f32 %v794_v62, %v774_v18  ;;  %v802_v3 = vadd.f32 %v798_v31, %v775_v20  ;;  %v803_v34 = vadd.f32 %v794_v62, %v776_v21  ;;  %v804_v6 = vadd.f32 %v798_v31, %v777_v23 }
 0x2e8   :  { %v805_v35 = vadd.f32 %v794_v62, %v778_v24  ;;  %v806_v12 = vadd.f32 %v798_v31, %v779_v25  ;;  %v807_v36 = vadd.f32 %v794_v62, %v780_v27  ;;  %v808_v19 = vadd.f32 %v798_v31, %v781_v28 }
 0x2e9   :  { %v809_v37 = vadd.f32 %v794_v62, %v782_v29  ;;  %v810_v26 = vadd.f32 %v798_v31, %v783_v30  ;;  %v811_v38 = vadd.f32 %v794_v62, %v784_v60  ;;  %v812_v40 = vadd.f32 %v798_v31, %v785_v61 }
 0x2ea   :  { %v813_v41 = vadd.f32 %v794_v62, %v786_v63  ;;  %v814_v33 = vadd.f32 %v798_v31, %v787_v0  ;;  %v815_v42 = vadd.f32 %v794_v62, %v788_v1  ;;  %v816_v39 = vadd.f32 %v798_v31, %v789_v2 }
 0x2eb   :  { %v817_v43 = vmax.f32 %v801_v32, 0.0  ;;  %v818_v45 = vmax.f32 %v802_v3, 0.0  ;;  %v819_v44 = vmax.f32 %v803_v34, 0.0  ;;  %v820_v51 = vmax.f32 %v804_v6, 0.0 }
 0x2ec   :  { %v821_v46 = vmax.f32 %v805_v35, 0.0  ;;  %v822_v47 = vmax.f32 %v806_v12, 0.0  ;;  %v823_v48 = vmax.f32 %v807_v36, 0.0  ;;  %v824_v49 = vmax.f32 %v808_v19, 0.0 }
 0x2ed   :  { %v825_v50 = vmax.f32 %v809_v37, 0.0  ;;  %v826_v52 = vmax.f32 %v810_v26, 0.0  ;;  %v827_v53 = vmax.f32 %v811_v38, 0.0  ;;  %v828_v54 = vmax.f32 %v812_v40, 0.0  ;;  %833 = vst [vmem:[%s1464_s6] sm:$0xff] %v817_v43  ;;  %834 = vst [vmem:[%s1464_s6 + $0x8] sm:$0xff] %v818_v45 }
 0x2ee   :  { %835 = vst [vmem:[%s1464_s6 + $0x10] sm:$0xff] %v819_v44  ;;  %836 = vst [vmem:[%s1464_s6 + $0x18] sm:$0xff] %v820_v51  ;;  %v829_v55 = vmax.f32 %v813_v41, 0.0  ;;  %v830_v56 = vmax.f32 %v814_v33, 0.0  ;;  %v831_v57 = vmax.f32 %v815_v42, 0.0  ;;  %v832_v58 = vmax.f32 %v816_v39, 0.0 }
 0x2ef   :  { %837 = vst [vmem:[%s1464_s6 + $0x20] sm:$0xff] %v821_v46  ;;  %838 = vst [vmem:[%s1464_s6 + $0x28] sm:$0xff] %v822_v47 }
 0x2f0   :  { %839 = vst [vmem:[%s1464_s6 + $0x30] sm:$0xff] %v823_v48  ;;  %840 = vst [vmem:[%s1464_s6 + $0x38] sm:$0xff] %v824_v49 }
 0x2f1   :  { %841 = vst [vmem:[%s1464_s6 + $0x40] sm:$0xff] %v825_v50  ;;  %842 = vst [vmem:[%s1464_s6 + $0x48] sm:$0xff] %v826_v52 }
 0x2f2   :  { %843 = vst [vmem:[%s1464_s6 + $0x50] sm:$0xff] %v827_v53  ;;  %844 = vst [vmem:[%s1464_s6 + $0x58] sm:$0xff] %v828_v54 }
 0x2f3   :  { %845 = vst [vmem:[%s1464_s6 + $0x60] sm:$0xff] %v829_v55  ;;  %846 = vst [vmem:[%s1464_s6 + $0x68] sm:$0xff] %v830_v56 }
 0x2f4   :  { %847 = vst [vmem:[%s1464_s6 + $0x70] sm:$0xff] %v831_v57  ;;  %848 = vst [vmem:[%s1464_s6 + $0x78] sm:$0xff] %v832_v58 }

</bundles_post_ra>
